<compile_context>
chip_gen: v5e
topology: v5e:2x2
jax: 0.10.0
libtpu: 0.0.40
codegen_flags: <defaults>
</compile_context>

<pallas_src>
import functools

import numpy as np
import jax
import jax.numpy as jnp
from jax.experimental import pallas as pl
from jax.experimental.pallas import tpu as pltpu

_VMEM_LIMIT = 48 * 1024 * 1024   # explicit scoped-VMEM cap (headroom on v7x's 64 MiB)


def _round_up(x, m):
    return (x + m - 1) // m * m


# ----------------------------------------------------------------------------
# Pallas kernels
# ----------------------------------------------------------------------------
def _mm_bias_kernel(*refs, has_residual):
    """Row-tiled 1x1 conv: y = x @ w + b (+ residual). bf16 inputs, f32 acc."""
    if has_residual:
        x_ref, w_ref, b_ref, r_ref, o_ref = refs
    else:
        x_ref, w_ref, b_ref, o_ref = refs
    y = jnp.dot(x_ref[...], w_ref[...], preferred_element_type=jnp.float32)
    y = y + b_ref[...]
    if has_residual:
        y = y + r_ref[...].astype(jnp.float32)
    o_ref[...] = y.astype(o_ref.dtype)


def _conv3x3_kernel(*refs, Wp, fuse_gn, apply_silu, apply_sigmoid,
                    has_residual, eps, inv_n):
    """3x3 'SAME' conv on a zero-padded, spatially flattened activation.

    xp_ref is (1, P, Cin) with P=(H+3)*(W+2); the 9 conv taps are static
    shifted slices of it (offset dy*(W+2)+dx), so no im2col tensor is ever
    materialized in HBM.  Optionally fuses GroupNorm(+SiLU) on the raw input
    (zero padding does not perturb the statistics; a precomputed mask
    re-zeroes the pads after the affine transform).  The output is
    (1, H*(W+2), Cout); the 2 trailing columns of each row are garbage and are
    sliced off by the wrapper.
    """
    it = iter(refs)
    xp_ref = next(it)                       # (1, P, Cin)
    w_ref = next(it)                        # (9, Cin, Cout)
    b_ref = next(it)                        # (1, Cout) f32
    if fuse_gn:
        gamma_ref = next(it)                # (1, Cin) f32
        beta_ref = next(it)                 # (1, Cin) f32
        gmap_ref = next(it)                 # (Cin, G) f32
        gmapt_ref = next(it)                # (G, Cin) f32
        mask_ref = next(it)                 # (P, 1) f32
    r_ref = next(it) if has_residual else None
    o_ref = next(it)                        # (1, H*Wp, Cout)

    if fuse_gn:
        x = xp_ref[0].astype(jnp.float32)                      # (P, Cin)
        mask = mask_ref[...]
        gm = gmap_ref[...]
        gmt = gmapt_ref[...]
        s = jnp.sum(x, axis=0, keepdims=True)                  # pads are zero
        mean_c = jnp.dot(jnp.dot(s, gm, preferred_element_type=jnp.float32) * inv_n,
                         gmt, preferred_element_type=jnp.float32)
        d = (x - mean_c) * mask                                # two-pass variance
        var_g = jnp.dot(jnp.sum(d * d, axis=0, keepdims=True), gm,
                        preferred_element_type=jnp.float32) * inv_n
        inv_c = jnp.dot(jax.lax.rsqrt(var_g + eps), gmt,
                        preferred_element_type=jnp.float32)
        h = d * inv_c * gamma_ref[...] + beta_ref[...]
        if apply_silu:
            h = h * jax.nn.sigmoid(h)
        h = h * mask                                           # re-zero padding
        h = h.astype(w_ref.dtype)                              # bf16 at MXU input
    else:
        h = xp_ref[0]                                          # already final/padded

    hwp, cout = o_ref.shape[1], o_ref.shape[2]
    acc = jnp.zeros((hwp, cout), jnp.float32)
    for dy in range(3):
        for dx in range(3):
            off = dy * Wp + dx
            tap = h[off:off + hwp, :]                          # static VMEM slice
            acc = acc + jnp.dot(tap, w_ref[dy * 3 + dx],
                                preferred_element_type=jnp.float32)
    acc = acc + b_ref[...]
    if has_residual:
        acc = acc + r_ref[0].astype(jnp.float32)
    if apply_sigmoid:
        acc = jax.nn.sigmoid(acc)
    o_ref[...] = acc.astype(o_ref.dtype)[None]


def _gn_kernel(x_ref, gamma_ref, beta_ref, gmap_ref, gmapt_ref, o_ref,
               *, apply_silu, eps, inv_n):
    """Standalone GroupNorm (+ optional SiLU), two-pass variance, f32 math."""
    x = x_ref[0].astype(jnp.float32)                           # (HW, C)
    gm = gmap_ref[...]
    gmt = gmapt_ref[...]
    s = jnp.sum(x, axis=0, keepdims=True)
    mean_c = jnp.dot(jnp.dot(s, gm, preferred_element_type=jnp.float32) * inv_n,
                     gmt, preferred_element_type=jnp.float32)
    d = x - mean_c
    var_g = jnp.dot(jnp.sum(d * d, axis=0, keepdims=True), gm,
                    preferred_element_type=jnp.float32) * inv_n
    inv_c = jnp.dot(jax.lax.rsqrt(var_g + eps), gmt,
                    preferred_element_type=jnp.float32)
    y = d * inv_c * gamma_ref[...] + beta_ref[...]
    if apply_silu:
        y = y * jax.nn.sigmoid(y)
    o_ref[...] = y.astype(o_ref.dtype)[None]


def _flash_attn_kernel(q_ref, k_ref, v_ref, o_ref, m_sc, l_sc, acc_sc, *, scale):
    """Spatial self-attention with online softmax over KV tiles."""
    kv = pl.program_id(1)

    @pl.when(kv == 0)
    def _():
        m_sc[...] = jnp.full(m_sc.shape, -jnp.inf, jnp.float32)
        l_sc[...] = jnp.zeros(l_sc.shape, jnp.float32)
        acc_sc[...] = jnp.zeros(acc_sc.shape, jnp.float32)

    q = q_ref[0]                                               # (HW, C) bf16
    k = k_ref[0]                                               # (tkv, C) bf16
    v = v_ref[0]
    s = jax.lax.dot_general(q, k, (((1,), (1,)), ((), ())),
                            preferred_element_type=jnp.float32) * scale
    m_prev = m_sc[...]
    m_new = jnp.maximum(m_prev, jnp.max(s, axis=-1, keepdims=True))
    alpha = jnp.exp(m_prev - m_new)
    p = jnp.exp(s - m_new)
    l_sc[...] = alpha * l_sc[...] + jnp.sum(p, axis=-1, keepdims=True)
    acc_sc[...] = alpha * acc_sc[...] + jnp.dot(
        p.astype(v.dtype), v, preferred_element_type=jnp.float32)
    m_sc[...] = m_new

    @pl.when(kv == pl.num_programs(1) - 1)
    def _():
        o_ref[...] = (acc_sc[...] *
                      pl.reciprocal(l_sc[...], approx=True)).astype(o_ref.dtype)[None]


# ----------------------------------------------------------------------------
# Wrappers (padding / reshape glue in XLA, compute in Pallas)
# ----------------------------------------------------------------------------
def conv1x1(x_nhwc, w, b, residual=None, out_dtype=jnp.bfloat16, row_tile=256):
    B, H, W, Cin = x_nhwc.shape
    Cout = w.shape[-1]
    N = B * H * W
    tile = row_tile if N >= row_tile else _round_up(N, 8)
    Np = _round_up(N, tile)
    xf = x_nhwc.reshape(N, Cin)
    if Np != N:
        xf = jnp.pad(xf, ((0, Np - N), (0, 0)))
    args = [xf, w, b.reshape(1, Cout).astype(jnp.float32)]
    in_specs = [pl.BlockSpec((tile, Cin), lambda i: (i, 0)),
                pl.BlockSpec((Cin, Cout), lambda i: (0, 0)),
                pl.BlockSpec((1, Cout), lambda i: (0, 0))]
    if residual is not None:
        rf = residual.reshape(N, Cout)
        if Np != N:
            rf = jnp.pad(rf, ((0, Np - N), (0, 0)))
        args.append(rf)
        in_specs.append(pl.BlockSpec((tile, Cout), lambda i: (i, 0)))
    y = pl.pallas_call(
        functools.partial(_mm_bias_kernel, has_residual=residual is not None),
        out_shape=jax.ShapeDtypeStruct((Np, Cout), out_dtype),
        grid=(Np // tile,),
        in_specs=in_specs,
        out_specs=pl.BlockSpec((tile, Cout), lambda i: (i, 0)),
        compiler_params=pltpu.CompilerParams(
            dimension_semantics=("parallel",), vmem_limit_bytes=_VMEM_LIMIT),
    )(*args)
    return y[:N].reshape(B, H, W, Cout)


def conv3x3(x_nhwc, w_hwio, b, *, gn=None, apply_silu=False, residual=None,
            apply_sigmoid=False, out_dtype=jnp.bfloat16):
    """3x3 SAME conv, optionally with fused GroupNorm(+SiLU) on the input.

    gn = (gamma, beta, num_groups) or None.
    """
    # TODO(synk): for large images (HW*C > ~1M) add H-tiling with a halo and a
    #             two-pass stats prologue instead of one whole-image block.
    B, H, W, Cin = x_nhwc.shape
    Cout = w_hwio.shape[-1]
    Wp = W + 2
    P = (H + 3) * Wp
    HWp = H * Wp

    xp = jnp.pad(x_nhwc, ((0, 0), (1, 2), (1, 1), (0, 0))).reshape(B, P, Cin)
    w9 = w_hwio.reshape(9, Cin, Cout)
    args = [xp, w9, b.reshape(1, Cout).astype(jnp.float32)]
    in_specs = [pl.BlockSpec((1, P, Cin), lambda i: (i, 0, 0)),
                pl.BlockSpec((9, Cin, Cout), lambda i: (0, 0, 0)),
                pl.BlockSpec((1, Cout), lambda i: (0, 0))]

    fuse_gn = gn is not None
    inv_n = 0.0
    if fuse_gn:
        gamma, beta, G = gn
        cpg = Cin // G
        inv_n = 1.0 / float(H * W * cpg)
        gmap = (np.arange(Cin)[:, None] // cpg ==
                np.arange(G)[None, :]).astype(np.float32)
        mask2d = np.zeros((H + 3, Wp), np.float32)
        mask2d[1:H + 1, 1:W + 1] = 1.0
        args += [gamma.reshape(1, Cin).astype(jnp.float32),
                 beta.reshape(1, Cin).astype(jnp.float32),
                 jnp.asarray(gmap), jnp.asarray(gmap.T),
                 jnp.asarray(mask2d.reshape(P, 1))]
        in_specs += [pl.BlockSpec((1, Cin), lambda i: (0, 0)),
                     pl.BlockSpec((1, Cin), lambda i: (0, 0)),
                     pl.BlockSpec((Cin, G), lambda i: (0, 0)),
                     pl.BlockSpec((G, Cin), lambda i: (0, 0)),
                     pl.BlockSpec((P, 1), lambda i: (0, 0))]

    if residual is not None:
        rp = jnp.pad(residual, ((0, 0), (0, 0), (0, 2), (0, 0))).reshape(B, HWp, Cout)
        args.append(rp)
        in_specs.append(pl.BlockSpec((1, HWp, Cout), lambda i: (i, 0, 0)))

    kernel = functools.partial(
        _conv3x3_kernel, Wp=Wp, fuse_gn=fuse_gn, apply_silu=apply_silu,
        apply_sigmoid=apply_sigmoid, has_residual=residual is not None,
        eps=1e-6, inv_n=inv_n)
    y = pl.pallas_call(
        kernel,
        out_shape=jax.ShapeDtypeStruct((B, HWp, Cout), out_dtype),
        grid=(B,),
        in_specs=in_specs,
        out_specs=pl.BlockSpec((1, HWp, Cout), lambda i: (i, 0, 0)),
        compiler_params=pltpu.CompilerParams(
            dimension_semantics=("parallel",), vmem_limit_bytes=_VMEM_LIMIT),
    )(*args)
    return y.reshape(B, H, Wp, Cout)[:, :, :W, :]


def group_norm(x_nhwc, gamma, beta, num_groups, apply_silu, eps=1e-6,
               out_dtype=jnp.bfloat16):
    B, H, W, C = x_nhwc.shape
    cpg = C // num_groups
    xf = x_nhwc.reshape(B, H * W, C)
    gmap = (np.arange(C)[:, None] // cpg ==
            np.arange(num_groups)[None, :]).astype(np.float32)
    kernel = functools.partial(_gn_kernel, apply_silu=apply_silu, eps=eps,
                               inv_n=1.0 / float(H * W * cpg))
    y = pl.pallas_call(
        kernel,
        out_shape=jax.ShapeDtypeStruct((B, H * W, C), out_dtype),
        grid=(B,),
        in_specs=[pl.BlockSpec((1, H * W, C), lambda i: (i, 0, 0)),
                  pl.BlockSpec((1, C), lambda i: (0, 0)),
                  pl.BlockSpec((1, C), lambda i: (0, 0)),
                  pl.BlockSpec((C, num_groups), lambda i: (0, 0)),
                  pl.BlockSpec((num_groups, C), lambda i: (0, 0))],
        out_specs=pl.BlockSpec((1, H * W, C), lambda i: (i, 0, 0)),
        compiler_params=pltpu.CompilerParams(
            dimension_semantics=("parallel",), vmem_limit_bytes=_VMEM_LIMIT),
    )(xf, gamma.reshape(1, C).astype(jnp.float32),
      beta.reshape(1, C).astype(jnp.float32),
      jnp.asarray(gmap), jnp.asarray(gmap.T))
    return y.reshape(B, H, W, C)


def flash_attention(q, k, v, out_dtype=jnp.bfloat16):
    B, HW, C = q.shape
    tkv = 128 if HW % 128 == 0 else HW
    kernel = functools.partial(_flash_attn_kernel, scale=float(C) ** -0.5)
    return pl.pallas_call(
        kernel,
        out_shape=jax.ShapeDtypeStruct((B, HW, C), out_dtype),
        grid=(B, HW // tkv),
        in_specs=[pl.BlockSpec((1, HW, C), lambda b, j: (b, 0, 0)),
                  pl.BlockSpec((1, tkv, C), lambda b, j: (b, j, 0)),
                  pl.BlockSpec((1, tkv, C), lambda b, j: (b, j, 0))],
        out_specs=pl.BlockSpec((1, HW, C), lambda b, j: (b, 0, 0)),
        scratch_shapes=[pltpu.VMEM((HW, 1), jnp.float32),
                        pltpu.VMEM((HW, 1), jnp.float32),
                        pltpu.VMEM((HW, C), jnp.float32)],
        compiler_params=pltpu.CompilerParams(
            dimension_semantics=("parallel", "arbitrary"),
            vmem_limit_bytes=_VMEM_LIMIT),
    )(q, k, v)


def upsample_nearest2x(x_nhwc):
    # TODO(synk): fuse the nearest-2x replication into the following conv3x3
    # kernel to avoid materializing the 4x activation in HBM.
    x = jnp.repeat(x_nhwc, 2, axis=1)
    return jnp.repeat(x, 2, axis=2)


# ----------------------------------------------------------------------------
# Parameter construction (mirrors Decoder.__init__) and forward
# ----------------------------------------------------------------------------
def build_decoder_params(config, key):
    m = config['model']
    hidden_dims = m['hidden_dims']
    block_configs = m['block_configs']
    downsample_positions = sorted(m['downsample_positions'])
    latent_dim = m['latent_dim']
    num_groups = m.get('num_groups', 32)
    data_channel = config['data']['data_channel']

    kit = iter(jax.random.split(key, 512))

    def conv_init(cin, cout, k, dtype=jnp.bfloat16):
        kw, kb = jax.random.split(next(kit))
        w = (jax.random.normal(kw, (k, k, cin, cout), jnp.float32)
             / np.sqrt(k * k * cin)).astype(dtype)
        b = 0.05 * jax.random.normal(kb, (cout,), jnp.float32)
        return w, b

    def norm_init(c):
        kg, kb = jax.random.split(next(kit))
        g = 1.0 + 0.1 * jax.random.normal(kg, (c,), jnp.float32)
        b = 0.1 * jax.random.normal(kb, (c,), jnp.float32)
        return g, b

    params = {'num_groups': num_groups}
    w_in, b_in = conv_init(latent_dim, hidden_dims[-1], 1)
    params['conv_in'] = (w_in[0, 0], b_in)

    blocks = []
    current = hidden_dims[-1]
    up_ctr = len(downsample_positions) - 1
    for i in range(len(block_configs)):
        out_dim = hidden_dims[max(len(hidden_dims) - 1 - i, 0)]
        btype = block_configs[i % len(block_configs)]['type']
        if btype == 'resnet':
            p = {}
            p['g1'], p['bn1'] = norm_init(current)
            p['w1'], p['bc1'] = conv_init(current, out_dim, 3)
            p['g2'], p['bn2'] = norm_init(out_dim)
            p['w2'], p['bc2'] = conv_init(out_dim, out_dim, 3)
            if current != out_dim:
                wsc, bsc = conv_init(current, out_dim, 1)
                p['wsc'], p['bsc'] = wsc[0, 0], bsc
            blocks.append(('resnet', p))
        elif btype == 'attention':
            p = {}
            p['g'], p['bn'] = norm_init(current)
            for name in ('q', 'k', 'v'):
                w_, b_ = conv_init(current, current, 1)
                p['w' + name], p['b' + name] = w_[0, 0], b_
            wp, bp = conv_init(current, out_dim, 1)
            p['wp'], p['bp'] = wp[0, 0], bp
            if current != out_dim:
                wsc, bsc = conv_init(current, out_dim, 1)
                p['wsc'], p['bsc'] = wsc[0, 0], bsc
            blocks.append(('attention', p))
        else:
            raise ValueError(f'Unknown block type: {btype}')
        current = out_dim
        if up_ctr >= 0 and i == len(block_configs) - 1 - up_ctr:
            wu, bu = conv_init(current, current, 3)
            blocks.append(('upsample', {'w': wu, 'b': bu}))
            up_ctr -= 1

    params['blocks'] = blocks
    params['conv_out'] = conv_init(current, data_channel, 3, dtype=jnp.float32)
    return params


def decoder_forward(params, z_nchw):
    G = params['num_groups']
    x = jnp.transpose(z_nchw, (0, 2, 3, 1)).astype(jnp.bfloat16)   # NCHW -> NHWC
    w_in, b_in = params['conv_in']
    x = conv1x1(x, w_in, b_in)
    for kind, p in params['blocks']:
        if kind == 'resnet':
            h = conv3x3(x, p['w1'], p['bc1'], gn=(p['g1'], p['bn1'], G),
                        apply_silu=True)
            sc = conv1x1(x, p['wsc'], p['bsc']) if 'wsc' in p else x
            x = conv3x3(h, p['w2'], p['bc2'], gn=(p['g2'], p['bn2'], G),
                        apply_silu=True, residual=sc)
        elif kind == 'attention':
            B, H, W, Cin = x.shape
            h = group_norm(x, p['g'], p['bn'], G, apply_silu=False)
            wqkv = jnp.concatenate([p['wq'], p['wk'], p['wv']], axis=1)
            bqkv = jnp.concatenate([p['bq'], p['bk'], p['bv']], axis=0)
            qkv = conv1x1(h, wqkv, bqkv).reshape(B, H * W, 3 * Cin)
            q = qkv[:, :, :Cin]
            k = qkv[:, :, Cin:2 * Cin]
            v = qkv[:, :, 2 * Cin:]
            a = flash_attention(q, k, v).reshape(B, H, W, Cin)
            sc = conv1x1(x, p['wsc'], p['bsc']) if 'wsc' in p else x
            x = conv1x1(a, p['wp'], p['bp'], residual=sc)
        else:  # upsample
            x = upsample_nearest2x(x)
            x = conv3x3(x, p['w'], p['b'])
    # mirrors: autocast(enabled=False) + x.float() + conv_out + sigmoid
    x = x.astype(jnp.float32)
    wo, bo = params['conv_out']
    x = conv3x3(x, wo, bo, apply_sigmoid=True, out_dtype=jnp.float32)
    return jnp.transpose(x, (0, 3, 1, 2))                  # NHWC -> NCHW


# ----------------------------------------------------------------------------
# Pure-JAX reference (same bf16 storage / f32 accumulation policy)
# ----------------------------------------------------------------------------
def _ref_gn(x, g, b, G, eps=1e-6):
    x = x.astype(jnp.float32)
    B, H, W, C = x.shape
    xr = x.reshape(B, H * W, G, C // G)
    mean = xr.mean(axis=(1, 3), keepdims=True)
    var = jnp.square(xr - mean).mean(axis=(1, 3), keepdims=True)
    xn = ((xr - mean) * jax.lax.rsqrt(var + eps)).reshape(B, H, W, C)
    return xn * g + b


def _ref_conv1x1(x, w, b):
    return jnp.einsum('bhwc,co->bhwo', x, w,
                      preferred_element_type=jnp.float32) + b


def _ref_conv3x3(x, w, b):
    y = jax.lax.conv_general_dilated(
        x, w, (1, 1), 'SAME', dimension_numbers=('NHWC', 'HWIO', 'NHWC'),
        preferred_element_type=jnp.float32)
    return y + b


def decoder_reference(params, z_nchw):
    G = params['num_groups']
    bf16 = jnp.bfloat16
    x = jnp.transpose(z_nchw, (0, 2, 3, 1)).astype(bf16)
    x = _ref_conv1x1(x, *params['conv_in']).astype(bf16)
    for kind, p in params['blocks']:
        if kind == 'resnet':
            h = jax.nn.silu(_ref_gn(x, p['g1'], p['bn1'], G)).astype(bf16)
            h = _ref_conv3x3(h, p['w1'], p['bc1']).astype(bf16)
            h2 = jax.nn.silu(_ref_gn(h, p['g2'], p['bn2'], G)).astype(bf16)
            sc = (_ref_conv1x1(x, p['wsc'], p['bsc']).astype(bf16)
                  if 'wsc' in p else x)
            x = (_ref_conv3x3(h2, p['w2'], p['bc2'])
                 + sc.astype(jnp.float32)).astype(bf16)
        elif kind == 'attention':
            B, H, W, C = x.shape
            h = _ref_gn(x, p['g'], p['bn'], G).astype(bf16)
            q = _ref_conv1x1(h, p['wq'], p['bq']).astype(bf16).reshape(B, H * W, C)
            k = _ref_conv1x1(h, p['wk'], p['bk']).astype(bf16).reshape(B, H * W, C)
            v = _ref_conv1x1(h, p['wv'], p['bv']).astype(bf16).reshape(B, H * W, C)
            logits = jnp.einsum('bic,bjc->bij', q, k,
                                preferred_element_type=jnp.float32) * (float(C) ** -0.5)
            att = jax.nn.softmax(logits, axis=-1)
            a = jnp.einsum('bij,bjc->bic', att.astype(bf16), v,
                           preferred_element_type=jnp.float32)
            a = a.astype(bf16).reshape(B, H, W, C)
            sc = (_ref_conv1x1(x, p['wsc'], p['bsc']).astype(bf16)
                  if 'wsc' in p else x)
            x = (_ref_conv1x1(a, p['wp'], p['bp'])
                 + sc.astype(jnp.float32)).astype(bf16)
        else:
            x = upsample_nearest2x(x)
            x = _ref_conv3x3(x, p['w'], p['b']).astype(bf16)
    x = x.astype(jnp.float32)
    wo, bo = params['conv_out']
    x = jax.nn.sigmoid(_ref_conv3x3(x, wo, bo))
    return jnp.transpose(x, (0, 3, 1, 2))


# ----------------------------------------------------------------------------
if __name__ == "__main__":
    config = {
        'model': {
            'hidden_dims': [16, 32],
            'block_configs': [{'type': 'resnet'}, {'type': 'attention'}],
            'downsample_positions': [0],
            'latent_dim': 4,
            'num_groups': 4,
        },
        'data': {'data_channel': 3},
    }
    key = jax.random.PRNGKey(0)
    pkey, zkey = jax.random.split(key)
    params = build_decoder_params(config, pkey)

    B, H0, W0 = 2, 16, 16
    z = jax.random.normal(zkey, (B, config['model']['latent_dim'], H0, W0),
                          jnp.float32)

    out = jax.block_until_ready(decoder_forward(params, z))
    ref = jax.block_until_ready(decoder_reference(params, z))

    assert out.shape == (B, config['data']['data_channel'], 2 * H0, 2 * W0), out.shape
    np.testing.assert_allclose(np.asarray(out, np.float32),
                               np.asarray(ref, np.float32),
                               atol=1e-2, rtol=1e-2)
    print("KERNEL_OK")
</pallas_src>

<mosaic_0001>
module attributes {stable_mosaic.version = 11 : i64} {
  func.func @_mm_bias_kernel(%arg0: i32, %arg1: memref<256x4xbf16, #tpu.memory_space<vmem>>, %arg2: memref<4x32xbf16, #tpu.memory_space<vmem>>, %arg3: memref<1x32xf32, #tpu.memory_space<vmem>>, %arg4: memref<256x32xbf16, #tpu.memory_space<vmem>>) attributes {dimension_semantics = [#tpu.dimension_semantics<parallel>], iteration_bounds = array<i64: 2>, scalar_prefetch = 0 : i64, scratch_operands = 0 : i64, tpu.core_type = #tpu.core_type<tc>, window_params = [{transform_indices = @transform_0, window_bounds = array<i64: 256, 4>}, {pipeline_mode = #tpu.pipeline_mode<synchronous>, transform_indices = @transform_1, window_bounds = array<i64: 4, 32>}, {pipeline_mode = #tpu.pipeline_mode<synchronous>, transform_indices = @transform_2, window_bounds = array<i64: 1, 32>}, {transform_indices = @transform_3, window_bounds = array<i64: 256, 32>}]} {
    %c0 = arith.constant 0 : index
    %c0_0 = arith.constant 0 : index
    %0 = vector.load %arg1[%c0, %c0_0] : memref<256x4xbf16, #tpu.memory_space<vmem>>, vector<256x4xbf16>
    %c0_1 = arith.constant 0 : index
    %c0_2 = arith.constant 0 : index
    %1 = vector.load %arg2[%c0_1, %c0_2] : memref<4x32xbf16, #tpu.memory_space<vmem>>, vector<4x32xbf16>
    %cst = arith.constant dense<0.000000e+00> : vector<256x32xf32>
    %2 = tpu.matmul %0, %1, %cst {dimension_numbers = #tpu.dot_dimension_numbers<[1], [0], [0], [1], [0, 0, 1, 1], [], []>} : vector<256x4xbf16>, vector<4x32xbf16>, vector<256x32xf32> -> vector<256x32xf32>
    %c0_3 = arith.constant 0 : index
    %c0_4 = arith.constant 0 : index
    %3 = vector.load %arg3[%c0_3, %c0_4] : memref<1x32xf32, #tpu.memory_space<vmem>>, vector<1x32xf32>
    %4 = vector.broadcast %3 : vector<1x32xf32> to vector<256x32xf32>
    %5 = arith.addf %2, %4 : vector<256x32xf32>
    %6 = arith.truncf %5 : vector<256x32xf32> to vector<256x32xbf16>
    %c0_5 = arith.constant 0 : index
    %c0_6 = arith.constant 0 : index
    %7 = vector.load %arg4[%c0_5, %c0_6] : memref<256x32xbf16, #tpu.memory_space<vmem>>, vector<256x32xbf16>
    tpu.vector_store %arg4[%c0_5, %c0_6], %6 {strides = array<i32>} : memref<256x32xbf16, #tpu.memory_space<vmem>>, vector<256x32xbf16>,
    return
  }
  func.func @transform_0(%arg0: i32) -> (i32, i32) {
    %c0_i32 = arith.constant 0 : i32
    %c0_i32_0 = arith.constant 0 : i32
    return %arg0, %c0_i32 : i32, i32
  }
  func.func @transform_1(%arg0: i32) -> (i32, i32) {
    %c0_i32 = arith.constant 0 : i32
    %c0_i32_0 = arith.constant 0 : i32
    %c0_i32_1 = arith.constant 0 : i32
    return %c0_i32, %c0_i32_0 : i32, i32
  }
  func.func @transform_2(%arg0: i32) -> (i32, i32) {
    %c0_i32 = arith.constant 0 : i32
    %c0_i32_0 = arith.constant 0 : i32
    %c0_i32_1 = arith.constant 0 : i32
    return %c0_i32, %c0_i32_0 : i32, i32
  }
  func.func @transform_3(%arg0: i32) -> (i32, i32) {
    %c0_i32 = arith.constant 0 : i32
    %c0_i32_0 = arith.constant 0 : i32
    return %arg0, %c0_i32 : i32, i32
  }
}

</mosaic_0001>

<bundles_post_ra>
// kernel: tpu_custom_call.1
= control target key start
LH: loop header
LB: loop body
LE: loop exit
PB: predicated region body
PF: predicated region fallthrough
CT: control target
= control target key end

     0   :  { %s702_s12 = smov 0   ;;  %s848_s0 = inlined_call_operand.vmem [shape: bf16[512,4], index: 0, kind: input, shape index: {}]   ;;  %s849_s1 = inlined_call_operand.vmem [shape: bf16[4,32], index: 1, kind: input, shape index: {}]   ;;  %s850_s2 = inlined_call_operand.vmem [shape: f32[1,32], index: 2, kind: input, shape index: {}]   ;;  %s851_s3 = inlined_call_operand.vmem [shape: bf16[512,32], index: 3, kind: output, shape index: {}]  }
   0x1 LB: > { %s555_s13 = sadd.s32 4294967295, %s680_s12   ;;  %p559_p0 = scmp.ge.s32.totalorder %s680_s12, 1  ;;  %s680_s12 = sphi %s702_s12, %s13_s12  }
   0x2   : > { %p138_p1 = scmp.lt.s32.totalorder %s680_s12, 3 }
   0x4   : > { %p139_p2 = pnand %p559_p0, %p138_p1 }
   0x5   : > { %s560_s16 = sshll.u32 (!%p139_p2), %s555_s13, 5 }
   0x6   : > { %142 = sbr.rel (%p139_p2) target bundleno = 211 (0xd3), region = 32  ;;  %p163_p3 = scmp.lt.s32.totalorder (!%p139_p2), %s560_s16, 63 }
   0xb   : > { %v207_v0 = vld [vmem:[%s849_s1] sm:$0x3]  ;;  %vm341_vm0 = vcmask 1041408   ;;  %s853_s16 = smov (!%p163_p3, %s560_s16), 63  ;;  %vm292_vm1 = vcmask 31744   ;;  %vm466_vm2 = vcmask 257024  }
   0xc   : > { %v343_v1 = vsel %vm341_vm0, %v207_v0, 0  ;;  %s561_s17 = sshll.u32 %s853_s16, 2  ;;  %v740_v18 = vld [vmem:[%s850_s2] ss:$0 sm:$0xff] }
   0xd   : > { %352 = vmatpush.bf16.msra.mxu0 %v343_v1  ;;  %662 = vmatpush.bf16.msra.mxu1 %v343_v1  ;;  %s166_s20 = scalar_lea.vmem %s848_s0, %s561_s17  ;;  %s749_s25 = scalar_lea.vmem %s851_s3, %s561_s17 }
   0xe   : > { %663 = vmatpush.bf16.msra.mxu2 %v343_v1  ;;  %664 = vmatpush.bf16.msra.mxu3 %v343_v1  ;;  %v646_v2 = vld [vmem:[%s166_s20] sm:$0xff]  ;;  %v647_v6 = vld [vmem:[%s166_s20 + $0x8] sm:$0xff]  ;;  %v648_v10 = vld [vmem:[%s166_s20 + $0x10] sm:$0xff] }
   0xf   : > { %v650_v3 = vld [vmem:[%s166_s20 + $0x20] sm:$0xff]  ;;  %v651_v7 = vld [vmem:[%s166_s20 + $0x28] sm:$0xff]  ;;  %v652_v11 = vld [vmem:[%s166_s20 + $0x30] sm:$0xff] }
  0x10   : > { %v654_v4 = vld [vmem:[%s166_s20 + $0x40] sm:$0xff]  ;;  %628 = vmatmul.msk.bf16.vlgmr.msra.gmra.mxu0 %vm292_vm1, %v646_v2  ;;  %632 = vmatmul.msk.bf16.vlgmr.msra.gmra.mxu1 %vm292_vm1, %v650_v3  ;;  %v655_v8 = vld [vmem:[%s166_s20 + $0x48] sm:$0xff]  ;;  %v656_v12 = vld [vmem:[%s166_s20 + $0x50] sm:$0xff] }
  0x11   : > { %v658_v5 = vld [vmem:[%s166_s20 + $0x60] sm:$0xff]  ;;  %636 = vmatmul.msk.bf16.vlgmr.msra.gmra.mxu2 %vm292_vm1, %v654_v4  ;;  %v659_v9 = vld [vmem:[%s166_s20 + $0x68] sm:$0xff]  ;;  %v660_v13 = vld [vmem:[%s166_s20 + $0x70] sm:$0xff] }
  0x12   : > { %640 = vmatmul.msk.bf16.vlgmr.msra.gmra.mxu3 %vm292_vm1, %v658_v5  ;;  %v649_v14 = vld [vmem:[%s166_s20 + $0x18] sm:$0xff] }
  0x13   : > { %v653_v15 = vld [vmem:[%s166_s20 + $0x38] sm:$0xff] }
  0x14   : > { %v657_v16 = vld [vmem:[%s166_s20 + $0x58] sm:$0xff] }
  0x15   : > { %v661_v17 = vld [vmem:[%s166_s20 + $0x78] sm:$0xff] }
  0x20   : > { %629 = vmatmul.msk.bf16.gmra.mxu0 %vm292_vm1, %v647_v6  ;;  %633 = vmatmul.msk.bf16.gmra.mxu1 %vm292_vm1, %v651_v7 }
  0x21   : > { %637 = vmatmul.msk.bf16.gmra.mxu2 %vm292_vm1, %v655_v8 }
  0x22   : > { %641 = vmatmul.msk.bf16.gmra.mxu3 %vm292_vm1, %v659_v9 }
  0x30   : > { %630 = vmatmul.msk.bf16.gmra.mxu0 %vm292_vm1, %v648_v10  ;;  %634 = vmatmul.msk.bf16.gmra.mxu1 %vm292_vm1, %v652_v11 }
  0x31   : > { %638 = vmatmul.msk.bf16.gmra.mxu2 %vm292_vm1, %v656_v12 }
  0x32   : > { %642 = vmatmul.msk.bf16.gmra.mxu3 %vm292_vm1, %v660_v13 }
  0x40   : > { %631 = vmatmul.msk.bf16.gmra.mxu0 %vm292_vm1, %v649_v14  ;;  %635 = vmatmul.msk.bf16.gmra.mxu1 %vm292_vm1, %v653_v15 }
  0x41   : > { %639 = vmatmul.msk.bf16.gmra.mxu2 %vm292_vm1, %v657_v16 }
  0x42   : > { %643 = vmatmul.msk.bf16.gmra.mxu3 %vm292_vm1, %v661_v17 }
  0x8d   : > { %v354_v19 = vpop.f32.mrf.mxu0  ;;  %v374_v20 = vpop.f32.mrf.mxu1 }
  0x8e   : > { %v355_v21 = vadd.f32 %v740_v18, %v354_v19  ;;  %v375_v22 = vadd.f32 %v740_v18, %v374_v20 }
  0x90   : > { %v434_v23 = vpack.c.bf16 %v355_v21, %v355_v21  ;;  %v442_v24 = vpack.c.bf16 %v375_v22, %v375_v22 }
  0x92   : > { %467 = vst.msk [vmem:[%s749_s25] sm:$0xf] %vm466_vm2, %v434_v23 }
  0x93   : > { %475 = vst.msk [vmem:[%s749_s25 + $0x20] sm:$0xf] %vm466_vm2, %v442_v24 }
  0x94   : > { %v394_v25 = vpop.f32.mrf.mxu2 }
  0x95   : > { %v414_v26 = vpop.f32.mrf.mxu3  ;;  %v395_v27 = vadd.f32 %v740_v18, %v394_v25  ;;  %v356_v29 = vpop.f32.mrf.mxu0 }
  0x96   : > { %v415_v28 = vadd.f32 %v740_v18, %v414_v26  ;;  %v376_v30 = vpop.f32.mrf.mxu1  ;;  %v357_v31 = vadd.f32 %v740_v18, %v356_v29 }
  0x97   : > { %v377_v32 = vadd.f32 %v740_v18, %v376_v30  ;;  %v450_v33 = vpack.c.bf16 %v395_v27, %v395_v27 }
  0x98   : > { %v458_v34 = vpack.c.bf16 %v415_v28, %v415_v28  ;;  %v435_v35 = vpack.c.bf16 %v357_v31, %v357_v31 }
  0x99   : > { %v443_v36 = vpack.c.bf16 %v377_v32, %v377_v32  ;;  %483 = vst.msk [vmem:[%s749_s25 + $0x40] sm:$0xf] %vm466_vm2, %v450_v33 }
  0x9a   : > { %491 = vst.msk [vmem:[%s749_s25 + $0x60] sm:$0xf] %vm466_vm2, %v458_v34 }
  0x9b   : > { %468 = vst.msk [vmem:[%s749_s25 + $0x4] sm:$0xf] %vm466_vm2, %v435_v35 }
  0x9c   : > { %476 = vst.msk [vmem:[%s749_s25 + $0x24] sm:$0xf] %vm466_vm2, %v443_v36  ;;  %v396_v37 = vpop.f32.mrf.mxu2 }
  0x9d   : > { %v416_v38 = vpop.f32.mrf.mxu3  ;;  %v397_v39 = vadd.f32 %v740_v18, %v396_v37  ;;  %v359_v41 = vpop.f32.mrf.mxu0 }
  0x9e   : > { %v417_v40 = vadd.f32 %v740_v18, %v416_v38  ;;  %v379_v42 = vpop.f32.mrf.mxu1  ;;  %v360_v43 = vadd.f32 %v740_v18, %v359_v41 }
  0x9f   : > { %v380_v44 = vadd.f32 %v740_v18, %v379_v42  ;;  %v451_v45 = vpack.c.bf16 %v397_v39, %v397_v39 }
  0xa0   : > { %v459_v46 = vpack.c.bf16 %v417_v40, %v417_v40  ;;  %v436_v47 = vpack.c.bf16 %v360_v43, %v360_v43 }
  0xa1   : > { %v444_v48 = vpack.c.bf16 %v380_v44, %v380_v44  ;;  %484 = vst.msk [vmem:[%s749_s25 + $0x44] sm:$0xf] %vm466_vm2, %v451_v45 }
  0xa2   : > { %492 = vst.msk [vmem:[%s749_s25 + $0x64] sm:$0xf] %vm466_vm2, %v459_v46 }
  0xa3   : > { %469 = vst.msk [vmem:[%s749_s25 + $0x8] sm:$0xf] %vm466_vm2, %v436_v47 }
  0xa4   : > { %477 = vst.msk [vmem:[%s749_s25 + $0x28] sm:$0xf] %vm466_vm2, %v444_v48  ;;  %v399_v49 = vpop.f32.mrf.mxu2 }
  0xa5   : > { %v419_v50 = vpop.f32.mrf.mxu3  ;;  %v400_v51 = vadd.f32 %v740_v18, %v399_v49  ;;  %v361_v53 = vpop.f32.mrf.mxu0 }
  0xa6   : > { %v420_v52 = vadd.f32 %v740_v18, %v419_v50  ;;  %v381_v54 = vpop.f32.mrf.mxu1  ;;  %v362_v55 = vadd.f32 %v740_v18, %v361_v53 }
  0xa7   : > { %v382_v56 = vadd.f32 %v740_v18, %v381_v54  ;;  %v452_v57 = vpack.c.bf16 %v400_v51, %v400_v51 }
  0xa8   : > { %v460_v58 = vpack.c.bf16 %v420_v52, %v420_v52  ;;  %v437_v59 = vpack.c.bf16 %v362_v55, %v362_v55 }
  0xa9   : > { %v445_v60 = vpack.c.bf16 %v382_v56, %v382_v56  ;;  %485 = vst.msk [vmem:[%s749_s25 + $0x48] sm:$0xf] %vm466_vm2, %v452_v57 }
  0xaa   : > { %493 = vst.msk [vmem:[%s749_s25 + $0x68] sm:$0xf] %vm466_vm2, %v460_v58 }
  0xab   : > { %470 = vst.msk [vmem:[%s749_s25 + $0xc] sm:$0xf] %vm466_vm2, %v437_v59 }
  0xac   : > { %478 = vst.msk [vmem:[%s749_s25 + $0x2c] sm:$0xf] %vm466_vm2, %v445_v60  ;;  %v401_v61 = vpop.f32.mrf.mxu2 }
  0xad   : > { %v421_v62 = vpop.f32.mrf.mxu3  ;;  %v402_v63 = vadd.f32 %v740_v18, %v401_v61  ;;  %v364_v1 = vpop.f32.mrf.mxu0 }
  0xae   : > { %v422_v0 = vadd.f32 %v740_v18, %v421_v62  ;;  %v384_v2 = vpop.f32.mrf.mxu1  ;;  %v365_v3 = vadd.f32 %v740_v18, %v364_v1 }
  0xaf   : > { %v385_v4 = vadd.f32 %v740_v18, %v384_v2  ;;  %v453_v5 = vpack.c.bf16 %v402_v63, %v402_v63 }
  0xb0   : > { %v461_v6 = vpack.c.bf16 %v422_v0, %v422_v0  ;;  %v438_v7 = vpack.c.bf16 %v365_v3, %v365_v3 }
  0xb1   : > { %v446_v8 = vpack.c.bf16 %v385_v4, %v385_v4  ;;  %486 = vst.msk [vmem:[%s749_s25 + $0x4c] sm:$0xf] %vm466_vm2, %v453_v5 }
  0xb2   : > { %494 = vst.msk [vmem:[%s749_s25 + $0x6c] sm:$0xf] %vm466_vm2, %v461_v6 }
  0xb3   : > { %471 = vst.msk [vmem:[%s749_s25 + $0x10] sm:$0xf] %vm466_vm2, %v438_v7 }
  0xb4   : > { %479 = vst.msk [vmem:[%s749_s25 + $0x30] sm:$0xf] %vm466_vm2, %v446_v8  ;;  %v404_v9 = vpop.f32.mrf.mxu2 }
  0xb5   : > { %v424_v10 = vpop.f32.mrf.mxu3  ;;  %v405_v11 = vadd.f32 %v740_v18, %v404_v9  ;;  %v366_v13 = vpop.f32.mrf.mxu0 }
  0xb6   : > { %v425_v12 = vadd.f32 %v740_v18, %v424_v10  ;;  %v386_v14 = vpop.f32.mrf.mxu1  ;;  %v367_v15 = vadd.f32 %v740_v18, %v366_v13 }
  0xb7   : > { %v387_v16 = vadd.f32 %v740_v18, %v386_v14  ;;  %v454_v17 = vpack.c.bf16 %v405_v11, %v405_v11 }
  0xb8   : > { %v462_v19 = vpack.c.bf16 %v425_v12, %v425_v12  ;;  %v439_v20 = vpack.c.bf16 %v367_v15, %v367_v15 }
  0xb9   : > { %v447_v21 = vpack.c.bf16 %v387_v16, %v387_v16  ;;  %487 = vst.msk [vmem:[%s749_s25 + $0x50] sm:$0xf] %vm466_vm2, %v454_v17 }
  0xba   : > { %495 = vst.msk [vmem:[%s749_s25 + $0x70] sm:$0xf] %vm466_vm2, %v462_v19 }
  0xbb   : > { %472 = vst.msk [vmem:[%s749_s25 + $0x14] sm:$0xf] %vm466_vm2, %v439_v20 }
  0xbc   : > { %480 = vst.msk [vmem:[%s749_s25 + $0x34] sm:$0xf] %vm466_vm2, %v447_v21  ;;  %v406_v22 = vpop.f32.mrf.mxu2 }
  0xbd   : > { %v426_v23 = vpop.f32.mrf.mxu3  ;;  %v407_v24 = vadd.f32 %v740_v18, %v406_v22  ;;  %v369_v26 = vpop.f32.mrf.mxu0 }
  0xbe   : > { %v427_v25 = vadd.f32 %v740_v18, %v426_v23  ;;  %v389_v27 = vpop.f32.mrf.mxu1  ;;  %v370_v28 = vadd.f32 %v740_v18, %v369_v26 }
  0xbf   : > { %v390_v29 = vadd.f32 %v740_v18, %v389_v27  ;;  %v455_v30 = vpack.c.bf16 %v407_v24, %v407_v24 }
  0xc0   : > { %v463_v31 = vpack.c.bf16 %v427_v25, %v427_v25  ;;  %v440_v32 = vpack.c.bf16 %v370_v28, %v370_v28 }
  0xc1   : > { %v448_v33 = vpack.c.bf16 %v390_v29, %v390_v29  ;;  %488 = vst.msk [vmem:[%s749_s25 + $0x54] sm:$0xf] %vm466_vm2, %v455_v30 }
  0xc2   : > { %496 = vst.msk [vmem:[%s749_s25 + $0x74] sm:$0xf] %vm466_vm2, %v463_v31 }
  0xc3   : > { %473 = vst.msk [vmem:[%s749_s25 + $0x18] sm:$0xf] %vm466_vm2, %v440_v32 }
  0xc4   : > { %481 = vst.msk [vmem:[%s749_s25 + $0x38] sm:$0xf] %vm466_vm2, %v448_v33  ;;  %v409_v34 = vpop.f32.mrf.mxu2 }
  0xc5   : > { %v429_v35 = vpop.f32.mrf.mxu3  ;;  %v410_v36 = vadd.f32 %v740_v18, %v409_v34  ;;  %v371_v38 = vpop.f32.mrf.mxu0 }
  0xc6   : > { %v430_v37 = vadd.f32 %v740_v18, %v429_v35  ;;  %v391_v39 = vpop.f32.mrf.mxu1  ;;  %v372_v40 = vadd.f32 %v740_v18, %v371_v38 }
  0xc7   : > { %v392_v41 = vadd.f32 %v740_v18, %v391_v39  ;;  %v456_v42 = vpack.c.bf16 %v410_v36, %v410_v36 }
  0xc8   : > { %v464_v43 = vpack.c.bf16 %v430_v37, %v430_v37  ;;  %v441_v44 = vpack.c.bf16 %v372_v40, %v372_v40 }
  0xc9   : > { %v449_v45 = vpack.c.bf16 %v392_v41, %v392_v41  ;;  %489 = vst.msk [vmem:[%s749_s25 + $0x58] sm:$0xf] %vm466_vm2, %v456_v42 }
  0xca   : > { %497 = vst.msk [vmem:[%s749_s25 + $0x78] sm:$0xf] %vm466_vm2, %v464_v43 }
  0xcb   : > { %474 = vst.msk [vmem:[%s749_s25 + $0x1c] sm:$0xf] %vm466_vm2, %v441_v44 }
  0xcc   : > { %482 = vst.msk [vmem:[%s749_s25 + $0x3c] sm:$0xf] %vm466_vm2, %v449_v45  ;;  %v411_v46 = vpop.f32.mrf.mxu2 }
  0xcd   : > { %v431_v47 = vpop.f32.mrf.mxu3  ;;  %v412_v48 = vadd.f32 %v740_v18, %v411_v46 }
  0xce   : > { %v432_v49 = vadd.f32 %v740_v18, %v431_v47 }
  0xcf   : > { %v457_v50 = vpack.c.bf16 %v412_v48, %v412_v48 }
  0xd0   : > { %v465_v51 = vpack.c.bf16 %v432_v49, %v432_v49 }
  0xd1   : > { %490 = vst.msk [vmem:[%s749_s25 + $0x5c] sm:$0xf] %vm466_vm2, %v457_v50 }
  0xd2   : > { %498 = vst.msk [vmem:[%s749_s25 + $0x7c] sm:$0xf] %vm466_vm2, %v465_v51 }
  0xd3 PF: > { %s13_s12 = sadd.s32 1, %s680_s12  }
  0xd4   : > { %p10_p4 = scmp.ge.s32.totalorder %s13_s12, 4  }
  0xd6   :  { %12 = sbr.rel (!%p10_p4) target bundleno = 1 (0x1), region = 62 }

</bundles_post_ra>
